<compile_context>
chip_gen: v5e
topology: v5e:2x2
jax: 0.10.0
libtpu: 0.0.40
codegen_flags: <defaults>
</compile_context>

<pallas_src>
import functools

import jax
import jax.numpy as jnp
from jax.experimental import pallas as pl
from jax.experimental.pallas import tpu as pltpu

EPS = 1e-5


def _residual_block_kernel(xk_ref, w_ref, xn_ref, gamma_ref, beta_ref, o_ref,
                           acc_ref, *, matmul_dtype):
    k = pl.program_id(1)

    # Partial Linear: x[:, k-tile] @ W[n-tile, k-tile]^T  (contract dim 1 of both).
    # Cast to bf16 per tile for MXU rate on v6e/v7x; accumulate in f32.
    y_part = jax.lax.dot_general(
        xk_ref[...].astype(matmul_dtype),
        w_ref[...].astype(matmul_dtype),
        dimension_numbers=(((1,), (1,)), ((), ())),
        preferred_element_type=jnp.float32,
    )

    @pl.when(k == 0)
    def _first():
        acc_ref[...] = y_part          # no zero-fill + add on the first K step

    @pl.when(k > 0)
    def _rest():
        acc_ref[...] += y_part

    @pl.when(k == pl.num_programs(1) - 1)
    def _finalize():
        y = acc_ref[...]                                  # (B, TN) f32, bias omitted
        # NOTE: the Linear bias is dropped on purpose — training-mode BatchNorm subtracts
        # the batch mean, which cancels the bias exactly.
        inv_b = 1.0 / y.shape[0]
        s1 = jnp.sum(y, axis=0, keepdims=True)            # single pass over y:
        s2 = jnp.sum(y * y, axis=0, keepdims=True)         #   sum(y) and sum(y*y)
        mean = s1 * inv_b
        var = s2 * inv_b - mean * mean                     # biased variance (PyTorch)
        # Fold BN affine into a per-column scale/shift: epilogue = one FMA per element.
        scale = gamma_ref[...] * jax.lax.rsqrt(var + EPS)  # (1, TN)
        shift = beta_ref[...] - mean * scale               # (1, TN)
        out = jnp.maximum(y * scale + shift, 0.0) + xn_ref[...]
        o_ref[...] = out.astype(o_ref.dtype)


def _pick_tile(h, candidates):
    for c in candidates:
        if h % c == 0:
            return c
    return h


def residual_block(x, w, gamma, beta, *, tn=None, tk=None,
                   matmul_dtype=jnp.bfloat16):
    """x: (B, H) f32.  w: (H, H) PyTorch-layout Linear weight (out, in).
    gamma/beta: (H,).  Linear bias is not needed (cancelled by training-mode BN)."""
    B, H = x.shape
    assert w.shape == (H, H)
    assert gamma.shape == (H,) and beta.shape == (H,)

    if tn is None:
        tn = _pick_tile(H, (256, 128))          # keep >=2 N-tiles for megacore when possible
    if tk is None:
        # Full-K when the per-step VMEM footprint is small: removes the K loop and the
        # re-streaming of x across N-tiles. Fall back to K-tiling for large H.
        if 4 * H * (B + tn) <= (8 << 20):
            tk = H
        else:
            tk = _pick_tile(H, (512, 256, 128))
    assert H % tn == 0 and H % tk == 0

    gamma2 = gamma.reshape(1, H)
    beta2 = beta.reshape(1, H)

    grid = (H // tn, H // tk)                   # (n, k): reduction axis last

    kernel = functools.partial(_residual_block_kernel, matmul_dtype=matmul_dtype)

    return pl.pallas_call(
        kernel,
        out_shape=jax.ShapeDtypeStruct((B, H), x.dtype),
        grid_spec=pltpu.PrefetchScalarGridSpec(
            num_scalar_prefetch=0,
            grid=grid,
            in_specs=[
                pl.BlockSpec((B, tk), lambda n, k: (0, k)),   # x, K-view for the matmul
                pl.BlockSpec((tn, tk), lambda n, k: (n, k)),  # W, PyTorch (out,in) layout
                pl.BlockSpec((B, tn), lambda n, k: (0, n)),   # x, N-view for the residual
                pl.BlockSpec((1, tn), lambda n, k: (0, n)),   # gamma
                pl.BlockSpec((1, tn), lambda n, k: (0, n)),   # beta
            ],
            out_specs=pl.BlockSpec((B, tn), lambda n, k: (0, n)),
            scratch_shapes=[pltpu.VMEM((B, tn), jnp.float32)],
        ),
        compiler_params=pltpu.CompilerParams(
            # feature tiles split across v7x's 2 TensorCores; K is the reduction axis
            dimension_semantics=("parallel", "arbitrary"),
            vmem_limit_bytes=32 * 1024 * 1024,
        ),
    )(x, w, x, gamma2, beta2)


def reference(x, w, b, gamma, beta, *, matmul_dtype=jnp.float32):
    """PyTorch-semantics reference (includes the Linear bias)."""
    y = jax.lax.dot_general(
        x.astype(matmul_dtype), w.astype(matmul_dtype),
        dimension_numbers=(((1,), (1,)), ((), ())),
        preferred_element_type=jnp.float32) + b
    mean = jnp.mean(y, axis=0, keepdims=True)
    var = jnp.mean((y - mean) ** 2, axis=0, keepdims=True)
    out = gamma * (y - mean) / jnp.sqrt(var + EPS) + beta
    return jnp.maximum(out, 0.0) + x


if __name__ == "__main__":
    key = jax.random.PRNGKey(0)
    # Small, lane-dense hidden dim (multiple of 128) and sublane-aligned batch.
    B, H = 32, 256

    kx, kw, kb, kg, kbeta = jax.random.split(key, 5)
    x = jax.random.normal(kx, (B, H), dtype=jnp.float32)

    # PyTorch-like init for Linear; non-trivial BN affine to exercise the scale/shift path.
    bound = 1.0 / (H ** 0.5)
    w = jax.random.uniform(kw, (H, H), dtype=jnp.float32, minval=-bound, maxval=bound)
    b = jax.random.uniform(kb, (H,), dtype=jnp.float32, minval=-bound, maxval=bound)
    gamma = 1.0 + 0.1 * jax.random.normal(kg, (H,), dtype=jnp.float32)
    beta = 0.1 * jax.random.normal(kbeta, (H,), dtype=jnp.float32)

    # Default tiling (full-K fast path, grid (1,1) here).
    out = jax.block_until_ready(residual_block(x, w, gamma, beta))
    # Explicit small tiles to exercise the K-tiled accumulator path (grid (2,2)).
    out_tiled = jax.block_until_ready(residual_block(x, w, gamma, beta, tn=128, tk=128))
    assert out.shape == (B, H)

    # Tight check vs a matched-precision reference (bf16 matmul inputs, f32 accumulate).
    # The reference INCLUDES the Linear bias that the kernel omits — matching here
    # demonstrates that training-mode BN cancels it exactly.
    ref_bf16 = reference(x, w, b, gamma, beta, matmul_dtype=jnp.bfloat16)
    assert jnp.allclose(out, ref_bf16, atol=1e-4, rtol=1e-4), "mismatch vs bf16 reference"
    assert jnp.allclose(out_tiled, ref_bf16, atol=1e-4, rtol=1e-4), "tiled mismatch vs bf16 ref"

    # Loose sanity check vs the full-f32 PyTorch-semantics reference (bf16 MXU inputs
    # introduce a small, expected precision delta).
    ref_f32 = reference(x, w, b, gamma, beta, matmul_dtype=jnp.float32)
    assert jnp.allclose(out, ref_f32, atol=0.1, rtol=0.1), "mismatch vs f32 reference"

    print("KERNEL_OK")
</pallas_src>

<mosaic_0001>
module attributes {stable_mosaic.version = 11 : i64} {
  func.func @_residual_block_kernel(%arg0: i32, %arg1: i32, %arg2: memref<32x256xf32, #tpu.memory_space<vmem>>, %arg3: memref<256x256xf32, #tpu.memory_space<vmem>>, %arg4: memref<32x256xf32, #tpu.memory_space<vmem>>, %arg5: memref<1x256xf32, #tpu.memory_space<vmem>>, %arg6: memref<1x256xf32, #tpu.memory_space<vmem>>, %arg7: memref<32x256xf32, #tpu.memory_space<vmem>>, %arg8: memref<32x256xf32, #tpu.memory_space<vmem>>) attributes {dimension_semantics = [#tpu.dimension_semantics<parallel>, #tpu.dimension_semantics<arbitrary>], iteration_bounds = array<i64: 1, 1>, scalar_prefetch = 0 : i64, scratch_operands = 1 : i64, tpu.core_type = #tpu.core_type<tc>, window_params = [{transform_indices = @transform_0, window_bounds = array<i64: 32, 256>}, {transform_indices = @transform_1, window_bounds = array<i64: 256, 256>}, {transform_indices = @transform_2, window_bounds = array<i64: 32, 256>}, {transform_indices = @transform_3, window_bounds = array<i64: 1, 256>}, {transform_indices = @transform_4, window_bounds = array<i64: 1, 256>}, {transform_indices = @transform_5, window_bounds = array<i64: 32, 256>}]} {
    %c0 = arith.constant 0 : index
    %c0_0 = arith.constant 0 : index
    %0 = vector.load %arg2[%c0, %c0_0] : memref<32x256xf32, #tpu.memory_space<vmem>>, vector<32x256xf32>
    %1 = arith.truncf %0 : vector<32x256xf32> to vector<32x256xbf16>
    %c0_1 = arith.constant 0 : index
    %c0_2 = arith.constant 0 : index
    %2 = vector.load %arg3[%c0_1, %c0_2] : memref<256x256xf32, #tpu.memory_space<vmem>>, vector<256x256xf32>
    %3 = arith.truncf %2 : vector<256x256xf32> to vector<256x256xbf16>
    %cst = arith.constant dense<0.000000e+00> : vector<32x256xf32>
    %4 = tpu.matmul %1, %3, %cst {dimension_numbers = #tpu.dot_dimension_numbers<[1], [1], [0], [0], [0, 0, 1, 0], [], []>} : vector<32x256xbf16>, vector<256x256xbf16>, vector<32x256xf32> -> vector<32x256xf32>
    %c0_i32 = arith.constant 0 : i32
    %5 = arith.cmpi eq, %arg1, %c0_i32 : i32
    %6 = arith.extui %5 : i1 to i32
    %c0_i32_3 = arith.constant 0 : i32
    %7 = arith.cmpi ne, %6, %c0_i32_3 : i32
    scf.if %7 {
      %c0_8 = arith.constant 0 : index
      %c0_9 = arith.constant 0 : index
      %14 = vector.load %arg8[%c0_8, %c0_9] : memref<32x256xf32, #tpu.memory_space<vmem>>, vector<32x256xf32>
      tpu.vector_store %arg8[%c0_8, %c0_9], %4 {strides = array<i32>} : memref<32x256xf32, #tpu.memory_space<vmem>>, vector<32x256xf32>,
    } else {
    }
    %c0_i32_4 = arith.constant 0 : i32
    %8 = arith.cmpi sgt, %arg1, %c0_i32_4 : i32
    %9 = arith.extui %8 : i1 to i32
    %c0_i32_5 = arith.constant 0 : i32
    %10 = arith.cmpi ne, %9, %c0_i32_5 : i32
    scf.if %10 {
      %c0_8 = arith.constant 0 : index
      %c0_9 = arith.constant 0 : index
      %14 = vector.load %arg8[%c0_8, %c0_9] : memref<32x256xf32, #tpu.memory_space<vmem>>, vector<32x256xf32>
      %15 = arith.addf %14, %4 : vector<32x256xf32>
      %c0_10 = arith.constant 0 : index
      %c0_11 = arith.constant 0 : index
      %16 = vector.load %arg8[%c0_10, %c0_11] : memref<32x256xf32, #tpu.memory_space<vmem>>, vector<32x256xf32>
      tpu.vector_store %arg8[%c0_10, %c0_11], %15 {strides = array<i32>} : memref<32x256xf32, #tpu.memory_space<vmem>>, vector<32x256xf32>,
    } else {
    }
    %c0_i32_6 = arith.constant 0 : i32
    %11 = arith.cmpi eq, %arg1, %c0_i32_6 : i32
    %12 = arith.extui %11 : i1 to i32
    %c0_i32_7 = arith.constant 0 : i32
    %13 = arith.cmpi ne, %12, %c0_i32_7 : i32
    scf.if %13 {
      %c0_8 = arith.constant 0 : index
      %c0_9 = arith.constant 0 : index
      %14 = vector.load %arg8[%c0_8, %c0_9] : memref<32x256xf32, #tpu.memory_space<vmem>>, vector<32x256xf32>
      %cst_10 = arith.constant dense<0.000000e+00> : vector<256xf32>
      %15 = vector.multi_reduction <add>, %14, %cst_10 [0] : vector<32x256xf32> to vector<256xf32>
      %16 = vector.shape_cast %15 : vector<256xf32> to vector<1x256xf32>
      %17 = arith.mulf %14, %14 : vector<32x256xf32>
      %cst_11 = arith.constant dense<0.000000e+00> : vector<256xf32>
      %18 = vector.multi_reduction <add>, %17, %cst_11 [0] : vector<32x256xf32> to vector<256xf32>
      %19 = vector.shape_cast %18 : vector<256xf32> to vector<1x256xf32>
      %cst_12 = arith.constant 3.125000e-02 : f32
      %20 = vector.broadcast %cst_12 : f32 to vector<1x256xf32>
      %21 = arith.mulf %16, %20 : vector<1x256xf32>
      %cst_13 = arith.constant 3.125000e-02 : f32
      %22 = vector.broadcast %cst_13 : f32 to vector<1x256xf32>
      %23 = arith.mulf %19, %22 : vector<1x256xf32>
      %24 = arith.mulf %21, %21 : vector<1x256xf32>
      %25 = arith.subf %23, %24 : vector<1x256xf32>
      %c0_14 = arith.constant 0 : index
      %c0_15 = arith.constant 0 : index
      %26 = vector.load %arg5[%c0_14, %c0_15] : memref<1x256xf32, #tpu.memory_space<vmem>>, vector<1x256xf32>
      %cst_16 = arith.constant 9.99999974E-6 : f32
      %27 = vector.broadcast %cst_16 : f32 to vector<1x256xf32>
      %28 = arith.addf %25, %27 : vector<1x256xf32>
      %29 = math.rsqrt %28 : vector<1x256xf32>
      %30 = arith.mulf %26, %29 : vector<1x256xf32>
      %c0_17 = arith.constant 0 : index
      %c0_18 = arith.constant 0 : index
      %31 = vector.load %arg6[%c0_17, %c0_18] : memref<1x256xf32, #tpu.memory_space<vmem>>, vector<1x256xf32>
      %32 = arith.mulf %21, %30 : vector<1x256xf32>
      %33 = arith.subf %31, %32 : vector<1x256xf32>
      %34 = vector.broadcast %30 : vector<1x256xf32> to vector<32x256xf32>
      %35 = arith.mulf %14, %34 : vector<32x256xf32>
      %36 = vector.broadcast %33 : vector<1x256xf32> to vector<32x256xf32>
      %37 = arith.addf %35, %36 : vector<32x256xf32>
      %cst_19 = arith.constant 0.000000e+00 : f32
      %38 = vector.broadcast %cst_19 : f32 to vector<32x256xf32>
      %39 = arith.maximumf %37, %38 : vector<32x256xf32>
      %c0_20 = arith.constant 0 : index
      %c0_21 = arith.constant 0 : index
      %40 = vector.load %arg4[%c0_20, %c0_21] : memref<32x256xf32, #tpu.memory_space<vmem>>, vector<32x256xf32>
      %41 = arith.addf %39, %40 : vector<32x256xf32>
      %c0_22 = arith.constant 0 : index
      %c0_23 = arith.constant 0 : index
      %42 = vector.load %arg7[%c0_22, %c0_23] : memref<32x256xf32, #tpu.memory_space<vmem>>, vector<32x256xf32>
      tpu.vector_store %arg7[%c0_22, %c0_23], %41 {strides = array<i32>} : memref<32x256xf32, #tpu.memory_space<vmem>>, vector<32x256xf32>,
    } else {
    }
    return
  }
  func.func @transform_0(%arg0: i32, %arg1: i32) -> (i32, i32) {
    %c0_i32 = arith.constant 0 : i32
    %c0_i32_0 = arith.constant 0 : i32
    return %c0_i32, %arg1 : i32, i32
  }
  func.func @transform_1(%arg0: i32, %arg1: i32) -> (i32, i32) {
    %c0_i32 = arith.constant 0 : i32
    return %arg0, %arg1 : i32, i32
  }
  func.func @transform_2(%arg0: i32, %arg1: i32) -> (i32, i32) {
    %c0_i32 = arith.constant 0 : i32
    %c0_i32_0 = arith.constant 0 : i32
    return %c0_i32, %arg0 : i32, i32
  }
  func.func @transform_3(%arg0: i32, %arg1: i32) -> (i32, i32) {
    %c0_i32 = arith.constant 0 : i32
    %c0_i32_0 = arith.constant 0 : i32
    return %c0_i32, %arg0 : i32, i32
  }
  func.func @transform_4(%arg0: i32, %arg1: i32) -> (i32, i32) {
    %c0_i32 = arith.constant 0 : i32
    %c0_i32_0 = arith.constant 0 : i32
    return %c0_i32, %arg0 : i32, i32
  }
  func.func @transform_5(%arg0: i32, %arg1: i32) -> (i32, i32) {
    %c0_i32 = arith.constant 0 : i32
    %c0_i32_0 = arith.constant 0 : i32
    return %c0_i32, %arg0 : i32, i32
  }
}

</mosaic_0001>

<bundles_post_ra>
// kernel: tpu_custom_call.1
= control target key start
LH: loop header
LB: loop body
LE: loop exit
PB: predicated region body
PF: predicated region fallthrough
CT: control target
= control target key end

     0   :  { %10 = vsyncpa [#allocation4], 0  ;;  %s741_s0 = inlined_call_operand.hbm [shape: f32[32,256], index: 0, kind: input, shape index: {}]   ;;  %s742_s1 = inlined_call_operand.hbm [shape: f32[256,256], index: 1, kind: input, shape index: {}]   ;;  %s743_s2 = inlined_call_operand.hbm [shape: f32[32,256], index: 2, kind: input, shape index: {}]   ;;  %s744_s3 = inlined_call_operand.vmem [shape: f32[1,256], index: 3, kind: input, shape index: {}]   ;;  %s745_s4 = inlined_call_operand.hbm [shape: f32[1,256], index: 4, kind: input, shape index: {}]   ;;  %s746_s5 = inlined_call_operand.hbm [shape: f32[32,256], index: 5, kind: output, shape index: {}]  }
   0x1   :  { %11 = vsyncpa [#allocation7], 0 }
   0x2   :  { %12 = vsyncpa [#allocation10], 0 }
   0x3   :  { %13 = vsyncpa [#allocation5], 0  ;;  %s31_s20 = sshll.u32 %s742_s1, 4  ;;  %s626_s21 = smov [#allocation6]   ;;  %s32_s20 = int_to_ptr.hbm [resolvable:$true] %s31_s20 }
   0x4   :  { %s33_s22 = sshll.u32 %s626_s21, 4  ;;  %s18_s25 = sshll.u32 %s741_s0, 4  ;;  %s34_s22 = int_to_ptr.vmem [resolvable:$true] %s33_s22  ;;  %s19_s25 = int_to_ptr.hbm [resolvable:$true] %s18_s25 }
   0x5   :  { %s627_s26 = smov 256   ;;  %s628_s27 = smov 16  }
   0x6   :  { %39 = dma.hbm_to_vmem [thread:$0]  %s32_s20, 8192, %s34_s22, [#allocation7], %s627_s26, %s627_s26, %s628_s27  }
   0x7   :  { %s629_s28 = smov [#allocation3]   ;;  %s44_s1 = sshll.u32 %s743_s2, 4  ;;  %s45_s1 = int_to_ptr.hbm [resolvable:$true] %s44_s1 }
   0x8   :  { %s20_s29 = sshll.u32 %s629_s28, 4  ;;  %s60_s8 = sshll.u32 %s745_s4, 4  ;;  %s21_s29 = int_to_ptr.vmem [resolvable:$true] %s20_s29  ;;  %s61_s8 = int_to_ptr.hbm [resolvable:$true] %s60_s8 }
   0x9   :  { %26 = dma.hbm_to_vmem [thread:$0]  %s19_s25, 1024, %s21_s29, [#allocation4], %s627_s26, %s627_s26, %s628_s27  }
   0xa   :  { %s630_s9 = smov [#allocation8]   ;;  %s631_s11 = smov [#allocation9]  }
   0xb   :  { %s46_s10 = sshll.u32 %s630_s9, 4  ;;  %s62_s2 = sshll.u32 %s631_s11, 4  ;;  %s47_s10 = int_to_ptr.vmem [resolvable:$true] %s46_s10  ;;  %s63_s2 = int_to_ptr.vmem [resolvable:$true] %s62_s2 }
   0xc   :  { %52 = dma.hbm_to_vmem [thread:$0]  %s45_s1, 1024, %s47_s10, [#allocation7], %s627_s26, %s627_s26, %s628_s27  }
   0xd   :  { %65 = dma.hbm_to_vmem [thread:$0]  %s61_s8, 32, %s63_s2, [#allocation10]  }
   0xe   :  { %618 = dma.done.wait [#allocation4], 1024  }
   0xf   :  { %619 = vsyncadd [#allocation4], 4294966272 }
  0x10   :  { %620 = dma.done.wait [#allocation7], 9216  }
  0x11   :  { %621 = vsyncadd [#allocation7], 4294958080 }
  0x12   :  { %622 = dma.done.wait [#allocation10], 32  }
  0x13   :  { %623 = vsyncadd [#allocation10], 4294967264  ;;  %v122_v0 = vld [vmem:[#allocation6 + $0xe0] sm:$0xff]  ;;  %v124_v1 = vld [vmem:[#allocation6 + $0xf0] sm:$0xff]  ;;  %vm395_vm5 = vcmask 1040384   ;;  %s472_s16 = sshll.u32 %s746_s5, 4  ;;  %s473_s16 = int_to_ptr.hbm [resolvable:$true] %s472_s16 }
  0x14   :  { %v123_v2 = vld [vmem:[#allocation6 + $0xe8] sm:$0xff]  ;;  %v172_v3 = vpack.c.bf16 %v124_v1, %v122_v0  ;;  %v125_v4 = vld [vmem:[#allocation6 + $0xf8] sm:$0xff]  ;;  %v154_v5 = vld [vmem:[#allocation6 + $0x1e0] sm:$0xff] }
  0x15   :  { %v156_v6 = vld [vmem:[#allocation6 + $0x1f0] sm:$0xff]  ;;  %v173_v7 = vpack.c.bf16 %v125_v4, %v123_v2  ;;  %v155_v9 = vld [vmem:[#allocation6 + $0x1e8] sm:$0xff]  ;;  %v157_v10 = vld [vmem:[#allocation6 + $0x1f8] sm:$0xff] }
  0x16   :  { %v188_v8 = vpack.c.bf16 %v156_v6, %v154_v5  ;;  %190 = vmatpush.bf16.xpose.msra.mxu0 %v172_v3  ;;  %v189_v11 = vpack.c.bf16 %v157_v10, %v155_v9  ;;  %v118_v12 = vld [vmem:[#allocation6 + $0xc0] sm:$0xff]  ;;  %v120_v13 = vld [vmem:[#allocation6 + $0xd0] sm:$0xff]  ;;  %v119_v14 = vld [vmem:[#allocation6 + $0xc8] sm:$0xff] }
  0x17   :  { %209 = vmatpush.bf16.xpose.msra.mxu1 %v173_v7  ;;  %v121_v15 = vld [vmem:[#allocation6 + $0xd8] sm:$0xff]  ;;  %v150_v16 = vld [vmem:[#allocation6 + $0x1c0] sm:$0xff]  ;;  %v152_v17 = vld [vmem:[#allocation6 + $0x1d0] sm:$0xff]  ;;  %v170_v20 = vpack.c.bf16 %v120_v13, %v118_v12 }
  0x18   :  { %228 = vmatpush.bf16.xpose.msra.mxu2 %v188_v8  ;;  %247 = vmatpush.bf16.xpose.msra.mxu3 %v189_v11  ;;  %v151_v18 = vld [vmem:[#allocation6 + $0x1c8] sm:$0xff]  ;;  %v153_v19 = vld [vmem:[#allocation6 + $0x1d8] sm:$0xff]  ;;  %v171_v21 = vpack.c.bf16 %v121_v15, %v119_v14  ;;  %v186_v22 = vpack.c.bf16 %v152_v17, %v150_v16  ;;  %v114_v24 = vld [vmem:[#allocation6 + $0xa0] sm:$0xff] }
  0x19   :  { %v187_v23 = vpack.c.bf16 %v153_v19, %v151_v18  ;;  %v116_v25 = vld [vmem:[#allocation6 + $0xb0] sm:$0xff]  ;;  %v115_v26 = vld [vmem:[#allocation6 + $0xa8] sm:$0xff]  ;;  %v117_v27 = vld [vmem:[#allocation6 + $0xb8] sm:$0xff] }
  0x1a   :  { %v146_v28 = vld [vmem:[#allocation6 + $0x1a0] sm:$0xff]  ;;  %v148_v29 = vld [vmem:[#allocation6 + $0x1b0] sm:$0xff]  ;;  %v147_v30 = vld [vmem:[#allocation6 + $0x1a8] sm:$0xff]  ;;  %v168_v32 = vpack.c.bf16 %v116_v25, %v114_v24  ;;  %v169_v33 = vpack.c.bf16 %v117_v27, %v115_v26 }
  0x1b   :  { %v149_v31 = vld [vmem:[#allocation6 + $0x1b8] sm:$0xff]  ;;  %v184_v34 = vpack.c.bf16 %v148_v29, %v146_v28  ;;  %v110_v36 = vld [vmem:[#allocation6 + $0x80] sm:$0xff]  ;;  %v112_v37 = vld [vmem:[#allocation6 + $0x90] sm:$0xff] }
  0x1c   :  { %v185_v35 = vpack.c.bf16 %v149_v31, %v147_v30  ;;  %v111_v38 = vld [vmem:[#allocation6 + $0x88] sm:$0xff]  ;;  %v113_v39 = vld [vmem:[#allocation6 + $0x98] sm:$0xff]  ;;  %v142_v40 = vld [vmem:[#allocation6 + $0x180] sm:$0xff]  ;;  %v166_v44 = vpack.c.bf16 %v112_v37, %v110_v36 }
  0x1d   :  { %v144_v41 = vld [vmem:[#allocation6 + $0x190] sm:$0xff]  ;;  %v143_v42 = vld [vmem:[#allocation6 + $0x188] sm:$0xff]  ;;  %v145_v43 = vld [vmem:[#allocation6 + $0x198] sm:$0xff]  ;;  %v167_v45 = vpack.c.bf16 %v113_v39, %v111_v38 }
  0x1e   :  { %191 = vmatpush.bf16.xpose.msra.mxu0 %v170_v20  ;;  %v182_v46 = vpack.c.bf16 %v144_v41, %v142_v40  ;;  %v183_v47 = vpack.c.bf16 %v145_v43, %v143_v42  ;;  %v106_v48 = vld [vmem:[#allocation6 + $0x60] sm:$0xff]  ;;  %v108_v49 = vld [vmem:[#allocation6 + $0x70] sm:$0xff]  ;;  %v107_v50 = vld [vmem:[#allocation6 + $0x68] sm:$0xff] }
  0x1f   :  { %210 = vmatpush.bf16.xpose.msra.mxu1 %v171_v21  ;;  %v109_v51 = vld [vmem:[#allocation6 + $0x78] sm:$0xff]  ;;  %v138_v52 = vld [vmem:[#allocation6 + $0x160] sm:$0xff]  ;;  %v140_v53 = vld [vmem:[#allocation6 + $0x170] sm:$0xff]  ;;  %v164_v56 = vpack.c.bf16 %v108_v49, %v106_v48 }
  0x20   :  { %229 = vmatpush.bf16.xpose.msra.mxu2 %v186_v22  ;;  %248 = vmatpush.bf16.xpose.msra.mxu3 %v187_v23  ;;  %v139_v54 = vld [vmem:[#allocation6 + $0x168] sm:$0xff]  ;;  %v141_v55 = vld [vmem:[#allocation6 + $0x178] sm:$0xff]  ;;  %v165_v57 = vpack.c.bf16 %v109_v51, %v107_v50  ;;  %v180_v58 = vpack.c.bf16 %v140_v53, %v138_v52  ;;  %v102_v60 = vld [vmem:[#allocation6 + $0x40] sm:$0xff] }
  0x21   :  { %v181_v59 = vpack.c.bf16 %v141_v55, %v139_v54  ;;  %v104_v61 = vld [vmem:[#allocation6 + $0x50] sm:$0xff]  ;;  %v103_v62 = vld [vmem:[#allocation6 + $0x48] sm:$0xff]  ;;  %v105_v63 = vld [vmem:[#allocation6 + $0x58] sm:$0xff] }
  0x22   :  { %v134_v0 = vld [vmem:[#allocation6 + $0x140] sm:$0xff]  ;;  %v136_v1 = vld [vmem:[#allocation6 + $0x150] sm:$0xff]  ;;  %v135_v2 = vld [vmem:[#allocation6 + $0x148] sm:$0xff]  ;;  %v162_v4 = vpack.c.bf16 %v104_v61, %v102_v60  ;;  %v163_v5 = vpack.c.bf16 %v105_v63, %v103_v62 }
  0x23   :  { %v137_v3 = vld [vmem:[#allocation6 + $0x158] sm:$0xff]  ;;  %v178_v6 = vpack.c.bf16 %v136_v1, %v134_v0  ;;  %v98_v8 = vld [vmem:[#allocation6 + $0x20] sm:$0xff]  ;;  %v100_v9 = vld [vmem:[#allocation6 + $0x30] sm:$0xff] }
  0x24   :  { %v179_v7 = vpack.c.bf16 %v137_v3, %v135_v2  ;;  %v99_v10 = vld [vmem:[#allocation6 + $0x28] sm:$0xff]  ;;  %v101_v11 = vld [vmem:[#allocation6 + $0x38] sm:$0xff]  ;;  %v130_v12 = vld [vmem:[#allocation6 + $0x120] sm:$0xff]  ;;  %v160_v16 = vpack.c.bf16 %v100_v9, %v98_v8 }
  0x25   :  { %v132_v13 = vld [vmem:[#allocation6 + $0x130] sm:$0xff]  ;;  %v131_v14 = vld [vmem:[#allocation6 + $0x128] sm:$0xff]  ;;  %v133_v15 = vld [vmem:[#allocation6 + $0x138] sm:$0xff]  ;;  %v161_v17 = vpack.c.bf16 %v101_v11, %v99_v10 }
  0x26   :  { %192 = vmatpush.bf16.xpose.msra.mxu0 %v168_v32  ;;  %v176_v18 = vpack.c.bf16 %v132_v13, %v130_v12  ;;  %v177_v19 = vpack.c.bf16 %v133_v15, %v131_v14  ;;  %v94_v20 = vld [vmem:[#allocation6] sm:$0xff]  ;;  %v96_v21 = vld [vmem:[#allocation6 + $0x10] sm:$0xff]  ;;  %v95_v22 = vld [vmem:[#allocation6 + $0x8] sm:$0xff] }
  0x27   :  { %211 = vmatpush.bf16.xpose.msra.mxu1 %v169_v33  ;;  %v97_v23 = vld [vmem:[#allocation6 + $0x18] sm:$0xff]  ;;  %v126_v24 = vld [vmem:[#allocation6 + $0x100] sm:$0xff]  ;;  %v128_v25 = vld [vmem:[#allocation6 + $0x110] sm:$0xff]  ;;  %v158_v28 = vpack.c.bf16 %v96_v21, %v94_v20 }
  0x28   :  { %230 = vmatpush.bf16.xpose.msra.mxu2 %v184_v34  ;;  %249 = vmatpush.bf16.xpose.msra.mxu3 %v185_v35  ;;  %v127_v26 = vld [vmem:[#allocation6 + $0x108] sm:$0xff]  ;;  %v129_v27 = vld [vmem:[#allocation6 + $0x118] sm:$0xff]  ;;  %v159_v29 = vpack.c.bf16 %v97_v23, %v95_v22  ;;  %v174_v30 = vpack.c.bf16 %v128_v25, %v126_v24  ;;  %v82_v32 = vld [vmem:[#allocation3] sm:$0xff] }
  0x29   :  { %v175_v31 = vpack.c.bf16 %v129_v27, %v127_v26  ;;  %v84_v33 = vld [vmem:[#allocation3 + $0x10] sm:$0xff]  ;;  %v83_v34 = vld [vmem:[#allocation3 + $0x8] sm:$0xff]  ;;  %v85_v35 = vld [vmem:[#allocation3 + $0x18] sm:$0xff] }
  0x2a   :  { %v90_v36 = vpack.c.bf16 %v84_v33, %v82_v32  ;;  %v91_v37 = vpack.c.bf16 %v85_v35, %v83_v34  ;;  %v86_v38 = vld [vmem:[#allocation3 + $0x20] sm:$0xff]  ;;  %v88_v39 = vld [vmem:[#allocation3 + $0x30] sm:$0xff]  ;;  %v87_v40 = vld [vmem:[#allocation3 + $0x28] sm:$0xff] }
  0x2b   :  { %v89_v41 = vld [vmem:[#allocation3 + $0x38] sm:$0xff]  ;;  %v92_v42 = vpack.c.bf16 %v88_v39, %v86_v38 }
  0x2c   :  { %v93_v43 = vpack.c.bf16 %v89_v41, %v87_v40 }
  0x2e   :  { %193 = vmatpush.bf16.xpose.msra.mxu0 %v166_v44 }
  0x2f   :  { %212 = vmatpush.bf16.xpose.msra.mxu1 %v167_v45 }
  0x30   :  { %231 = vmatpush.bf16.xpose.msra.mxu2 %v182_v46  ;;  %250 = vmatpush.bf16.xpose.msra.mxu3 %v183_v47 }
  0x36   :  { %194 = vmatpush.bf16.xpose.msra.mxu0 %v164_v56 }
  0x37   :  { %213 = vmatpush.bf16.xpose.msra.mxu1 %v165_v57 }
  0x38   :  { %232 = vmatpush.bf16.xpose.msra.mxu2 %v180_v58  ;;  %251 = vmatpush.bf16.xpose.msra.mxu3 %v181_v59 }
  0x3e   :  { %195 = vmatpush.bf16.xpose.msra.mxu0 %v162_v4 }
  0x3f   :  { %214 = vmatpush.bf16.xpose.msra.mxu1 %v163_v5 }
  0x40   :  { %233 = vmatpush.bf16.xpose.msra.mxu2 %v178_v6  ;;  %252 = vmatpush.bf16.xpose.msra.mxu3 %v179_v7 }
  0x46   :  { %196 = vmatpush.bf16.xpose.msra.mxu0 %v160_v16 }
  0x47   :  { %215 = vmatpush.bf16.xpose.msra.mxu1 %v161_v17 }
  0x48   :  { %234 = vmatpush.bf16.xpose.msra.mxu2 %v176_v18  ;;  %253 = vmatpush.bf16.xpose.msra.mxu3 %v177_v19 }
  0x4e   :  { %197 = vmatpush.bf16.xpose.msra.mxu0 %v158_v28 }
  0x4f   :  { %216 = vmatpush.bf16.xpose.msra.mxu1 %v159_v29 }
  0x50   :  { %235 = vmatpush.bf16.xpose.msra.mxu2 %v174_v30  ;;  %254 = vmatpush.bf16.xpose.msra.mxu3 %v175_v31 }
  0x55   :  { %198 = vmatmul.bf16.vlgmr.msra.gmra.mxu0 %v90_v36 }
  0x56   :  { %217 = vmatmul.bf16.vlgmr.msra.gmra.mxu1 %v91_v37 }
  0x57   :  { %236 = vmatmul.bf16.vlgmr.msra.gmra.mxu2 %v90_v36  ;;  %255 = vmatmul.bf16.vlgmr.msra.gmra.mxu3 %v91_v37 }
  0x65   :  { %203 = vmatmul.bf16.gmra.mxu0 %v92_v42 }
  0x66   :  { %222 = vmatmul.bf16.gmra.mxu1 %v93_v43 }
  0x67   :  { %241 = vmatmul.bf16.gmra.mxu2 %v92_v42  ;;  %260 = vmatmul.bf16.gmra.mxu3 %v93_v43 }
  0xd2   :  { %v199_v44 = vpop.f32.mrf.mxu0 }
  0xd3   :  { %v218_v45 = vpop.f32.mrf.mxu1 }
  0xd4   :  { %v684_v54 = vadd.f32 %v218_v45, %v199_v44 }
  0xd6   :  { %v335_v57 = vmul.f32 %v684_v54, %v684_v54 }
  0xda   :  { %v237_v46 = vpop.f32.mrf.mxu2  ;;  %v256_v47 = vpop.f32.mrf.mxu3 }
  0xdb   :  { %v201_v48 = vpop.f32.mrf.mxu0  ;;  %v220_v49 = vpop.f32.mrf.mxu1  ;;  %v703_v5 = vadd.f32 %v256_v47, %v237_v46 }
  0xdc   :  { %v686_v55 = vadd.f32 %v220_v49, %v201_v48 }
  0xdd   :  { %v336_v13 = vmul.f32 %v703_v5, %v703_v5 }
  0xde   :  { %v337_v58 = vmul.f32 %v686_v55, %v686_v55  ;;  %v317_v60 = vadd.f32 %v686_v55, %v684_v54 }
  0xe0   :  { %v343_v2 = vadd.f32 %v337_v58, %v335_v57 }
  0xe2   :  { %v239_v50 = vpop.f32.mrf.mxu2  ;;  %v258_v51 = vpop.f32.mrf.mxu3 }
  0xe3   :  { %v204_v52 = vpop.f32.mrf.mxu0  ;;  %v223_v53 = vpop.f32.mrf.mxu1  ;;  %v698_v0 = vadd.f32 %v258_v51, %v239_v50 }
  0xe4   :  { %v688_v56 = vadd.f32 %v223_v53, %v204_v52 }
  0xe5   :  { %v338_v10 = vmul.f32 %v698_v0, %v698_v0  ;;  %v326_v14 = vadd.f32 %v698_v0, %v703_v5 }
  0xe6   :  { %v339_v61 = vmul.f32 %v688_v56, %v688_v56  ;;  %v318_v3 = vadd.f32 %v317_v60, %v688_v56 }
  0xe7   :  { %v352_v20 = vadd.f32 %v338_v10, %v336_v13 }
  0xe8   :  { %v344_v7 = vadd.f32 %v343_v2, %v339_v61 }
  0xea   :  { %v242_v59 = vpop.f32.mrf.mxu2  ;;  %v261_v62 = vpop.f32.mrf.mxu3 }
  0xeb   :  { %v206_v63 = vpop.f32.mrf.mxu0  ;;  %v225_v1 = vpop.f32.mrf.mxu1  ;;  %v705_v6 = vadd.f32 %v261_v62, %v242_v59 }
  0xec   :  { %v701_v4 = vadd.f32 %v225_v1, %v206_v63 }
  0xed   :  { %v340_v15 = vmul.f32 %v705_v6, %v705_v6  ;;  %v327_v21 = vadd.f32 %v326_v14, %v705_v6  ;;  %v369_v14 = vld [vmem:[%s744_s3] sm:$0x3]  ;;  %s632_s3 = smov [#allocation11]  }
  0xee   :  { %v319_v8 = vadd.f32 %v318_v3, %v701_v4  ;;  %v341_v9 = vmul.f32 %v701_v4, %v701_v4  ;;  %s470_s13 = sshll.u32 %s632_s3, 4  ;;  %s471_s13 = int_to_ptr.vmem [resolvable:$true] %s470_s13 }
  0xef   :  { %v353_v25 = vadd.f32 %v352_v20, %v340_v15 }
  0xf0   :  { %v320_v11 = vrot.slane %v319_v8, 4  ;;  %v345_v12 = vadd.f32 %v344_v7, %v341_v9 }
  0xf2   :  { %v244_v16 = vpop.f32.mrf.mxu2  ;;  %v321_v17 = vadd.f32 %v320_v11, %v319_v8  ;;  %v346_v18 = vrot.slane %v345_v12, 4  ;;  %v263_v19 = vpop.f32.mrf.mxu3 }
  0xf3   :  { %v719_v22 = vadd.f32 %v263_v19, %v244_v16 }
  0xf4   :  { %v322_v23 = vrot.slane %v321_v17, 2  ;;  %v347_v24 = vadd.f32 %v346_v18, %v345_v12 }
  0xf5   :  { %v328_v26 = vadd.f32 %v327_v21, %v719_v22  ;;  %v342_v27 = vmul.f32 %v719_v22, %v719_v22 }
  0xf6   :  { %v323_v28 = vadd.f32 %v322_v23, %v321_v17  ;;  %v348_v29 = vrot.slane %v347_v24, 2  ;;  %v399_v23 = vld [vmem:[#allocation9] sm:$0x3] }
  0xf7   :  { %v329_v30 = vrot.slane %v328_v26, 4  ;;  %v354_v31 = vadd.f32 %v353_v25, %v342_v27 }
  0xf8   :  { %v324_v32 = vrot.slane %v323_v28, 1  ;;  %v349_v33 = vadd.f32 %v348_v29, %v347_v24 }
  0xf9   :  { %v330_v34 = vadd.f32 %v329_v30, %v328_v26  ;;  %v355_v35 = vrot.slane %v354_v31, 4 }
  0xfa   :  { %v325_v36 = vadd.f32 %v324_v32, %v323_v28  ;;  %v350_v37 = vrot.slane %v349_v33, 1 }
  0xfb   :  { %v331_v38 = vrot.slane %v330_v34, 2  ;;  %v356_v39 = vadd.f32 %v355_v35, %v354_v31 }
  0xfc   :  { %v351_v40 = vadd.f32 %v350_v37, %v349_v33  ;;  %v361_v41 = vmul.f32 0.03125, %v325_v36 }
  0xfd   :  { %v332_v42 = vadd.f32 %v331_v38, %v330_v34  ;;  %v357_v43 = vrot.slane %v356_v39, 2 }
  0xfe   :  { %v363_v44 = vmul.f32 0.03125, %v351_v40  ;;  %v365_v45 = vmul.f32 %v361_v41, %v361_v41 }
  0xff   :  { %v333_v46 = vrot.slane %v332_v42, 1  ;;  %v358_v47 = vadd.f32 %v357_v43, %v356_v39  ;;  %v443_v43 = vld [vmem:[#allocation8 + $0x8] sm:$0xff] }
 0x100   :  { %v367_v48 = vsub.f32 %v363_v44, %v365_v45 }
 0x101   :  { %v334_v49 = vadd.f32 %v333_v46, %v332_v42  ;;  %v359_v50 = vrot.slane %v358_v47, 1 }
 0x102   :  { %v370_v51 = vadd.f32 1e-05, %v367_v48 }
 0x103   :  { %v360_v52 = vadd.f32 %v359_v50, %v358_v47  ;;  %v362_v53 = vmul.f32 0.03125, %v334_v49  ;;  %v449_v47 = vld [vmem:[#allocation8 + $0x38] sm:$0xff]  ;;  %v442_v49 = vld [vmem:[#allocation8] sm:$0xff]  ;;  %v444_v50 = vld [vmem:[#allocation8 + $0x10] sm:$0xff] }
 0x104   :  { %494 = vrsqrt.f32 %v370_v51  ;;  %vm378_vm4 = vweird.f32 %v370_v51 }
 0x105   :  { %v364_v57 = vmul.f32 0.03125, %v360_v52  ;;  %v366_v58 = vmul.f32 %v362_v53, %v362_v53 }
 0x107   :  { %v368_v59 = vsub.f32 %v364_v57, %v366_v58  ;;  %v446_v57 = vld [vmem:[#allocation8 + $0x20] sm:$0xff] }
 0x109   :  { %v371_v60 = vadd.f32 1e-05, %v368_v59 }
 0x10a   :  { %v495_v61 = vpop.eup %494 }
 0x10b   :  { %v373_v62 = vmul.f32 %v495_v61, %v370_v51  ;;  %496 = vrsqrt.f32 %v371_v60  ;;  %vm379_vm1 = vweird.f32 %v495_v61  ;;  %vm388_vm2 = vweird.f32 %v371_v60 }
 0x10c   :  { %vm380_vm6 = vmor %vm378_vm4, %vm379_vm1 }
 0x10d   :  { %v374_v63 = vmul.f32 %v495_v61, %v373_v62 }
 0x10f   :  { %v375_v2 = vmul.f32 0.5, %v374_v63 }
 0x111   :  { %v497_v1 = vpop.eup %496  ;;  %v376_v8 = vsub.f32 1.5, %v375_v2 }
 0x112   :  { %v383_v3 = vmul.f32 %v497_v1, %v371_v60  ;;  %vm389_vm0 = vweird.f32 %v497_v1  ;;  %v448_v60 = vld [vmem:[#allocation8 + $0x30] sm:$0xff] }
 0x113   :  { %v377_v11 = vmul.f32 %v495_v61, %v376_v8  ;;  %vm390_vm3 = vmor %vm388_vm2, %vm389_vm0 }
 0x114   :  { %v384_v7 = vmul.f32 %v497_v1, %v383_v3 }
 0x115   :  { %v381_v16 = vsel %vm380_vm6, %v495_v61, %v377_v11 }
 0x116   :  { %v385_v9 = vmul.f32 0.5, %v384_v7 }
 0x118   :  { %v386_v10 = vsub.f32 1.5, %v385_v9 }
 0x11a   :  { %v387_v12 = vmul.f32 %v497_v1, %v386_v10 }
 0x11c   :  { %v391_v13 = vsel %vm390_vm3, %v497_v1, %v387_v12 }
 0x11d   :  { %v394_v15 = vrot.slane %v391_v13, 7 }
 0x11f   :  { %v396_v17 = vsel %vm395_vm5, %v381_v16, %v394_v15 }
 0x120   :  { %v398_v18 = vmul.f32 %v396_v17, %v369_v14 }
 0x122   :  { %v401_v19 = vperm.slane %v398_v18, 0  ;;  %v402_v20 = vperm.slane %v398_v18, 1 }
 0x124   :  { %v406_v21 = vmul.f32 %v402_v20, %v362_v53  ;;  %v405_v24 = vmul.f32 %v401_v19, %v361_v41  ;;  %v413_v28 = vmul.f32 %v401_v19, %v684_v54  ;;  %v414_v29 = vmul.f32 %v402_v20, %v703_v5 }
 0x125   :  { %v415_v30 = vmul.f32 %v401_v19, %v686_v55  ;;  %v416_v31 = vmul.f32 %v402_v20, %v698_v0  ;;  %v417_v34 = vmul.f32 %v401_v19, %v688_v56  ;;  %v418_v35 = vmul.f32 %v402_v20, %v705_v6  ;;  %v445_v0 = vld [vmem:[#allocation8 + $0x18] sm:$0xff]  ;;  %v447_v56 = vld [vmem:[#allocation8 + $0x28] sm:$0xff] }
 0x126   :  { %v409_v25 = vrot.slane %v406_v21, 7  ;;  %v419_v36 = vmul.f32 %v401_v19, %v701_v4  ;;  %v420_v37 = vmul.f32 %v402_v20, %v719_v22 }
 0x128   :  { %v410_v26 = vsel %vm395_vm5, %v405_v24, %v409_v25 }
 0x129   :  { %v412_v27 = vsub.f32 %v399_v23, %v410_v26 }
 0x12b   :  { %v422_v32 = vperm.slane %v412_v27, 0  ;;  %v423_v33 = vperm.slane %v412_v27, 1 }
 0x12d   :  { %v426_v38 = vadd.f32 %v422_v32, %v413_v28  ;;  %v427_v39 = vadd.f32 %v423_v33, %v414_v29  ;;  %v428_v40 = vadd.f32 %v422_v32, %v415_v30  ;;  %v429_v54 = vadd.f32 %v423_v33, %v416_v31 }
 0x12e   :  { %v430_v41 = vadd.f32 %v422_v32, %v417_v34  ;;  %v431_v5 = vadd.f32 %v423_v33, %v418_v35  ;;  %v432_v42 = vadd.f32 %v422_v32, %v419_v36  ;;  %v433_v55 = vadd.f32 %v423_v33, %v420_v37 }
 0x12f   :  { %v434_v44 = vmax.f32 %v426_v38, 0.0  ;;  %v435_v45 = vmax.f32 %v427_v39, 0.0  ;;  %v437_v46 = vmax.f32 %v429_v54, 0.0  ;;  %v436_v6 = vmax.f32 %v428_v40, 0.0 }
 0x130   :  { %v439_v48 = vmax.f32 %v431_v5, 0.0  ;;  %v441_v4 = vmax.f32 %v433_v55, 0.0  ;;  %v438_v22 = vmax.f32 %v430_v41, 0.0  ;;  %v440_v53 = vmax.f32 %v432_v42, 0.0 }
 0x131   :  { %v451_v51 = vadd.f32 %v443_v43, %v435_v45  ;;  %v453_v52 = vadd.f32 %v445_v0, %v437_v46  ;;  %v450_v61 = vadd.f32 %v442_v49, %v434_v44  ;;  %v452_v62 = vadd.f32 %v444_v50, %v436_v6 }
 0x132   :  { %v455_v58 = vadd.f32 %v447_v56, %v439_v48  ;;  %v457_v59 = vadd.f32 %v449_v47, %v441_v4  ;;  %v454_v63 = vadd.f32 %v446_v57, %v438_v22  ;;  %v456_v1 = vadd.f32 %v448_v60, %v440_v53 }
 0x133   :  { %459 = vst [vmem:[#allocation11 + $0x8] sm:$0xff] %v451_v51 }
 0x134   :  { %461 = vst [vmem:[#allocation11 + $0x18] sm:$0xff] %v453_v52 }
 0x135   :  { %463 = vst [vmem:[#allocation11 + $0x28] sm:$0xff] %v455_v58 }
 0x136   :  { %465 = vst [vmem:[#allocation11 + $0x38] sm:$0xff] %v457_v59 }
 0x137   :  { %458 = vst [vmem:[#allocation11] sm:$0xff] %v450_v61 }
 0x138   :  { %460 = vst [vmem:[#allocation11 + $0x10] sm:$0xff] %v452_v62 }
 0x139   :  { %462 = vst [vmem:[#allocation11 + $0x20] sm:$0xff] %v454_v63 }
 0x13a   :  { %464 = vst [vmem:[#allocation11 + $0x30] sm:$0xff] %v456_v1 }
 0x13b   :  { %478 = dma.vmem_to_hbm [thread:$0]  %s471_s13, 1024, %s473_s16, [#allocation5], %s627_s26, %s627_s26, %s628_s27  }
 0x13c   :  { %624 = dma.done.wait [#allocation5], 1024  }
 0x13d   :  { %625 = vsyncadd [#allocation5], 4294966272 }
 0x13e   :  { %483 = vsyncpa [#allocation4], 1 }
 0x13f   :  { %484 = vsyncpa [#allocation7], 1 }
 0x140   :  { %485 = vsyncpa [#allocation10], 1 }
 0x141   :  { %486 = vsyncpa [#allocation5], 1 }

</bundles_post_ra>
